<compile_context>
chip_gen: v7x
topology: tpu7x:2x2x1
jax: 0.10.0
libtpu: 0.0.40
codegen_flags: <defaults>
</compile_context>

<pallas_src>
import functools

import jax
import jax.numpy as jnp
from jax import lax
from jax.experimental import pallas as pl
from jax.experimental.pallas import tpu as pltpu

_LANE = 128


def _layernorm2d_kernel(x_ref, w_ref, b_ref, o_ref, *, eps: float):
    """Channel LayerNorm on a (1, C, T) tile; reduction over axis=1 (channels)."""
    x = x_ref[...].astype(jnp.float32)               # (1, C, T)
    # Two-pass (torch-form) stats over the channel (sublane) axis.
    u = jnp.mean(x, axis=1, keepdims=True)           # (1, 1, T)
    d = x - u
    s = jnp.mean(d * d, axis=1, keepdims=True)       # biased variance, as in torch
    inv = lax.rsqrt(s + eps)                         # EUP rsqrt (not bit-exact vs 1/sqrt)
    w = w_ref[...].astype(jnp.float32)               # (1, C, 1), VMEM-resident
    b = b_ref[...].astype(jnp.float32)               # (1, C, 1)
    o_ref[...] = ((d * inv) * w + b).astype(o_ref.dtype)


def _vmem_policy():
    """Per-generation (vmem_limit_bytes, working_set_budget_bytes)."""
    cap = None
    try:
        info = pltpu.get_tpu_info()
        cap = getattr(info, "vmem_capacity_bytes", None)
    except Exception:
        cap = None
    if cap is None:
        cap = 64 * 1024 * 1024                       # conservative default
    if cap >= 96 * 1024 * 1024:
        # v5e / v6e: 128 MiB physical VMEM -> larger blocks, 64 MiB scoped limit.
        return 64 * 1024 * 1024, 48 * 1024 * 1024
    # v7x: 64 MiB per TC (or unknown hardware) -> stay conservative.
    return 48 * 1024 * 1024, 32 * 1024 * 1024


def _choose_hw_tile(n_channels: int, hw: int, itemsize: int,
                    working_set_budget: int) -> int:
    """Largest multiple-of-128 spatial tile whose full VMEM working set fits.

    Working set per grid step for a (1, C, T) tile:
      2x double-buffered input block   : 2 * C*T * itemsize
      2x double-buffered output block  : 2 * C*T * itemsize
      ~3 tile-sized f32 temporaries    : 3 * C*T * 4   (x_f32, d, affine product)
    """
    bytes_per_lane_col = n_channels * (4 * itemsize + 3 * 4)
    max_t = (working_set_budget // bytes_per_lane_col) // _LANE * _LANE
    max_t = max(_LANE, max_t)
    # TODO(synk): if C is so large that even a 128-lane tile blows the budget,
    # a two-pass channel-split reduction would be needed; not implemented.
    hw_ceil = ((hw + _LANE - 1) // _LANE) * _LANE    # no divisor constraint
    hw_tile = min(max_t, hw_ceil)
    if hw_tile >= hw:
        # Whole spatial extent fits in one block: use a full-extent block
        # (always a legal BlockSpec, no tail padding needed).
        return hw
    return hw_tile


def layernorm2d(x: jax.Array, weight: jax.Array, bias: jax.Array,
                eps: float = 1e-6, *,
                working_set_budget: int | None = None) -> jax.Array:
    """Channel LayerNorm for NCHW tensors (ConvNeXt / detectron2 LayerNorm2d)."""
    N, C, H, W = x.shape
    HW = H * W

    vmem_limit, default_budget = _vmem_policy()
    budget = default_budget if working_set_budget is None else working_set_budget

    # Lane-dense view: fused spatial dim (H*W) becomes the lane axis (free reshape).
    x3 = x.reshape(N, C, HW)
    w3 = weight.reshape(1, C, 1)
    b3 = bias.reshape(1, C, 1)

    hw_tile = _choose_hw_tile(C, HW, x.dtype.itemsize, budget)
    n_spatial = -(-HW // hw_tile)                    # cdiv; tail block padded/masked
    grid = (N, n_spatial)

    kernel = functools.partial(_layernorm2d_kernel, eps=eps)

    x_spec = pl.BlockSpec((1, C, hw_tile), lambda n, s: (n, 0, s))
    wb_spec = pl.BlockSpec((1, C, 1), lambda n, s: (0, 0, 0))     # resident params
    out_spec = pl.BlockSpec((1, C, hw_tile), lambda n, s: (n, 0, s))

    y3 = pl.pallas_call(
        kernel,
        out_shape=jax.ShapeDtypeStruct((N, C, HW), x.dtype),
        grid_spec=pltpu.PrefetchScalarGridSpec(
            num_scalar_prefetch=0,
            grid=grid,
            in_specs=[x_spec, wb_spec, wb_spec],
            out_specs=out_spec,
        ),
        compiler_params=pltpu.CompilerParams(
            dimension_semantics=("parallel", "parallel"),
            vmem_limit_bytes=vmem_limit,
        ),
    )(x3, w3, b3)

    return y3.reshape(N, C, H, W)


if __name__ == "__main__":
    key = jax.random.PRNGKey(0)
    kx, kw, kb, kx2 = jax.random.split(key, 4)

    eps = 1e-6

    def ref_fn(x, w, b):
        u = jnp.mean(x, axis=1, keepdims=True)
        s = jnp.mean((x - u) ** 2, axis=1, keepdims=True)
        y = (x - u) / jnp.sqrt(s + eps)
        return w[None, :, None, None] * y + b[None, :, None, None]

    # Case 1: canonical small NCHW input (HW = 256, a multiple of 128).
    N, C, H, W = 2, 4, 16, 16
    x = jax.random.normal(kx, (N, C, H, W), dtype=jnp.float32)
    weight = jnp.ones((C,), jnp.float32) + 0.1 * jax.random.normal(kw, (C,), jnp.float32)
    bias = 0.1 * jax.random.normal(kb, (C,), jnp.float32)
    ref = ref_fn(x, weight, bias)

    out = jax.block_until_ready(layernorm2d(x, weight, bias, eps))
    assert out.shape == (N, C, H, W)
    assert jnp.allclose(out, ref, atol=1e-5, rtol=1e-5), "mismatch (default path)"

    # Case 2: force a multi-tile spatial grid (tiny working-set budget -> 128-lane
    # tiles, grid=(2, 2)) to exercise the pipelined multi-step path.
    out_tiled = jax.block_until_ready(
        layernorm2d(x, weight, bias, eps, working_set_budget=16 * 1024))
    assert jnp.allclose(out_tiled, ref, atol=1e-5, rtol=1e-5), "mismatch (tiled path)"

    # Case 3: spatial size NOT a multiple of 128 (HW = 100) -> full-extent
    # spatial block path for non-128 shapes that fit the budget.
    N2, C2, H2, W2 = 2, 6, 10, 10
    x2 = jax.random.normal(kx2, (N2, C2, H2, W2), dtype=jnp.float32)
    w2 = jnp.ones((C2,), jnp.float32)
    b2 = jnp.zeros((C2,), jnp.float32)
    ref2 = ref_fn(x2, w2, b2)
    out2 = jax.block_until_ready(layernorm2d(x2, w2, b2, eps))
    assert jnp.allclose(out2, ref2, atol=1e-5, rtol=1e-5), "mismatch (non-128 HW)"

    # Case 4: non-dividing tail block (HW = 144, tile = 128 -> last block extends
    # past the array; OOB reads are unused, OOB writes discarded).
    N3, C3, H3, W3 = 2, 4, 12, 12
    x3_in = jax.random.normal(kx, (N3, C3, H3, W3), dtype=jnp.float32)
    w3p = jnp.ones((C3,), jnp.float32)
    b3p = jnp.zeros((C3,), jnp.float32)
    ref3 = ref_fn(x3_in, w3p, b3p)
    out3 = jax.block_until_ready(
        layernorm2d(x3_in, w3p, b3p, eps, working_set_budget=16 * 1024))
    assert jnp.allclose(out3, ref3, atol=1e-5, rtol=1e-5), "mismatch (tail block)"

    print("KERNEL_OK")
</pallas_src>

<mosaic_0001>
module attributes {stable_mosaic.version = 11 : i64} {
  func.func @_layernorm2d_kernel(%arg0: i32, %arg1: i32, %arg2: memref<1x4x256xf32, #tpu.memory_space<vmem>>, %arg3: memref<1x4x1xf32, #tpu.memory_space<vmem>>, %arg4: memref<1x4x1xf32, #tpu.memory_space<vmem>>, %arg5: memref<1x4x256xf32, #tpu.memory_space<vmem>>) attributes {dimension_semantics = [#tpu.dimension_semantics<parallel>, #tpu.dimension_semantics<parallel>], iteration_bounds = array<i64: 2, 1>, scalar_prefetch = 0 : i64, scratch_operands = 0 : i64, tpu.core_type = #tpu.core_type<tc>, window_params = [{transform_indices = @transform_0, window_bounds = array<i64: 1, 4, 256>}, {pipeline_mode = #tpu.pipeline_mode<synchronous>, transform_indices = @transform_1, window_bounds = array<i64: 1, 4, 1>}, {pipeline_mode = #tpu.pipeline_mode<synchronous>, transform_indices = @transform_2, window_bounds = array<i64: 1, 4, 1>}, {transform_indices = @transform_3, window_bounds = array<i64: 1, 4, 256>}]} {
    %c0 = arith.constant 0 : index
    %c0_0 = arith.constant 0 : index
    %c0_1 = arith.constant 0 : index
    %0 = vector.load %arg2[%c0, %c0_0, %c0_1] : memref<1x4x256xf32, #tpu.memory_space<vmem>>, vector<1x4x256xf32>
    %cst = arith.constant dense<0.000000e+00> : vector<1x256xf32>
    %1 = vector.multi_reduction <add>, %0, %cst [1] : vector<1x4x256xf32> to vector<1x256xf32>
    %2 = vector.shape_cast %1 : vector<1x256xf32> to vector<1x1x256xf32>
    %cst_2 = arith.constant 4.000000e+00 : f32
    %3 = vector.broadcast %cst_2 : f32 to vector<1x1x256xf32>
    %4 = arith.divf %2, %3 : vector<1x1x256xf32>
    %5 = vector.broadcast %4 : vector<1x1x256xf32> to vector<1x4x256xf32>
    %6 = arith.subf %0, %5 : vector<1x4x256xf32>
    %7 = arith.mulf %6, %6 : vector<1x4x256xf32>
    %cst_3 = arith.constant dense<0.000000e+00> : vector<1x256xf32>
    %8 = vector.multi_reduction <add>, %7, %cst_3 [1] : vector<1x4x256xf32> to vector<1x256xf32>
    %9 = vector.shape_cast %8 : vector<1x256xf32> to vector<1x1x256xf32>
    %cst_4 = arith.constant 4.000000e+00 : f32
    %10 = vector.broadcast %cst_4 : f32 to vector<1x1x256xf32>
    %11 = arith.divf %9, %10 : vector<1x1x256xf32>
    %cst_5 = arith.constant 9.99999997E-7 : f32
    %12 = vector.broadcast %cst_5 : f32 to vector<1x1x256xf32>
    %13 = arith.addf %11, %12 : vector<1x1x256xf32>
    %14 = math.rsqrt %13 : vector<1x1x256xf32>
    %c0_6 = arith.constant 0 : index
    %c0_7 = arith.constant 0 : index
    %c0_8 = arith.constant 0 : index
    %15 = vector.load %arg3[%c0_6, %c0_7, %c0_8] : memref<1x4x1xf32, #tpu.memory_space<vmem>>, vector<1x4x1xf32>
    %c0_9 = arith.constant 0 : index
    %c0_10 = arith.constant 0 : index
    %c0_11 = arith.constant 0 : index
    %16 = vector.load %arg4[%c0_9, %c0_10, %c0_11] : memref<1x4x1xf32, #tpu.memory_space<vmem>>, vector<1x4x1xf32>
    %17 = vector.broadcast %14 : vector<1x1x256xf32> to vector<1x4x256xf32>
    %18 = arith.mulf %6, %17 : vector<1x4x256xf32>
    %19 = vector.broadcast %15 : vector<1x4x1xf32> to vector<1x4x256xf32>
    %20 = arith.mulf %18, %19 : vector<1x4x256xf32>
    %21 = vector.broadcast %16 : vector<1x4x1xf32> to vector<1x4x256xf32>
    %22 = arith.addf %20, %21 : vector<1x4x256xf32>
    %c0_12 = arith.constant 0 : index
    %c0_13 = arith.constant 0 : index
    %c0_14 = arith.constant 0 : index
    %23 = vector.load %arg5[%c0_12, %c0_13, %c0_14] : memref<1x4x256xf32, #tpu.memory_space<vmem>>, vector<1x4x256xf32>
    tpu.vector_store %arg5[%c0_12, %c0_13, %c0_14], %22 {strides = array<i32>} : memref<1x4x256xf32, #tpu.memory_space<vmem>>, vector<1x4x256xf32>,
    return
  }
  func.func @transform_0(%arg0: i32, %arg1: i32) -> (i32, i32, i32) {
    %c0_i32 = arith.constant 0 : i32
    %c0_i32_0 = arith.constant 0 : i32
    return %arg0, %c0_i32, %arg1 : i32, i32, i32
  }
  func.func @transform_1(%arg0: i32, %arg1: i32) -> (i32, i32, i32) {
    %c0_i32 = arith.constant 0 : i32
    %c0_i32_0 = arith.constant 0 : i32
    %c0_i32_1 = arith.constant 0 : i32
    %c0_i32_2 = arith.constant 0 : i32
    return %c0_i32, %c0_i32_0, %c0_i32_1 : i32, i32, i32
  }
  func.func @transform_2(%arg0: i32, %arg1: i32) -> (i32, i32, i32) {
    %c0_i32 = arith.constant 0 : i32
    %c0_i32_0 = arith.constant 0 : i32
    %c0_i32_1 = arith.constant 0 : i32
    %c0_i32_2 = arith.constant 0 : i32
    return %c0_i32, %c0_i32_0, %c0_i32_1 : i32, i32, i32
  }
  func.func @transform_3(%arg0: i32, %arg1: i32) -> (i32, i32, i32) {
    %c0_i32 = arith.constant 0 : i32
    %c0_i32_0 = arith.constant 0 : i32
    return %arg0, %c0_i32, %arg1 : i32, i32, i32
  }
}

</mosaic_0001>

<bundles_post_ra>
// kernel: tpu_custom_call.1
= control target key start
LH: loop header
LB: loop body
LE: loop exit
PB: predicated region body
PF: predicated region fallthrough
CT: control target
= control target key end

     0   :  { %8 = vsyncpa [#allocation3], 0  ;;  %s804_s0 = inlined_call_operand.hbm [shape: f32[2,4,256], index: 0, kind: input, shape index: {}]   ;;  %s805_s1 = inlined_call_operand.vmem [shape: f32[1,4,1], index: 1, kind: input, shape index: {}]   ;;  %s806_s2 = inlined_call_operand.vmem [shape: f32[1,4,1], index: 2, kind: input, shape index: {}]   ;;  %s807_s3 = inlined_call_operand.hbm [shape: f32[2,4,256], index: 3, kind: output, shape index: {}]  }
   0x1   :  { %10 = vsyncpa [#allocation3 + $0x1], 0 }
   0x2   :  { %11 = vsyncpa [#allocation4], 0 }
   0x3   :  { %13 = vsyncpa [#allocation4 + $0x1], 0  ;;  %s618_s12 = smov 0   ;;  %s620_s13 = smov 0  }
   0x4   :  { %s622_s14 = smov 0   ;;  %s624_s15 = smov 0  }
   0x5   :  { %s626_s16 = smov 0   ;;  %s628_s17 = smov 0  }
   0x6 LB: > { %s393_s18 = sadd.s32 4294967295, %s592_s17   ;;  %s394_s19 = sadd.s32 4294967294, %s592_s17   ;;  %s592_s17 = sphi %s628_s17, %s19_s17   ;;  %s588_s16 = sphi %s626_s16, %s823_s16   ;;  %s584_s15 = sphi %s624_s15, %s822_s15   ;;  %s580_s14 = sphi %s622_s14, %s821_s14   ;;  %s576_s13 = sphi %s620_s13, %s820_s13   ;;  %s572_s12 = sphi %s618_s12, %s819_s12  }
   0x7   : > { %s31_s20 = sadd.s32 1, %s588_s16  ;;  %s40_s21 = sadd.s32 1, %s580_s14 }
   0x8   : > { %p33_p0 = scmp.ge.s32.totalorder %s31_s20, 2  ;;  %p47_p1 = scmp.ne.s32.totalorder %s580_s14, %s576_s13 }
   0x9   : > { %p48_p2 = scmp.eq.s32.totalorder %s592_s17, 0  ;;  %p53_p3 = scmp.ne.s32.totalorder %s576_s13, %s572_s12 }
   0xa   : > { %s825_s20 = smov (%p33_p0, %s31_s20), 0  ;;  %p54_p5 = scmp.eq.s32.totalorder %s393_s18, 0 }
   0xb   : > { %p659_p4 = por %p48_p2, %p47_p1  ;;  %s35_s23 = ssub.s32 %s588_s16, %s825_s20 }
   0xc   : > { %p121_p6 = scmp.eq.s32.totalorder %s393_s18, 1  ;;  %p38_p7 = scmp.eq.s32.totalorder %s35_s23, 0 }
   0xd   : > { %p665_p8 = por %p54_p5, %p53_p3  ;;  %p127_p10 = scmp.eq.s32.totalorder %s394_s19, 1 }
   0xe   : > { %p669_p9 = por %p121_p6, %p47_p1  ;;  %p422_p13 = scmp.lt.s32.totalorder %s592_s17, 2 }
   0xf   : > { %s674_s26 = scalar_select %p38_p7, %s580_s14, %s40_s21  }
  0x10   : > { %s811_s25 = scalar_select %p669_p9, 1, 0 }
  0x11   : > { %p676_p11 = por %p127_p10, %p53_p3  ;;  %s153_s28 = sand.u32 1, %s580_s14  }
  0x12   : > { %s397_s29 = sshll.u32 %s153_s28, 3  ;;  %s408_s30 = sshll.u32 %s588_s16, 7 }
  0x13   : > { %s812_s27 = scalar_select %p676_p11, 1, 0 }
  0x14   : > { %s687_s6 = scalar_lea.hbm %s804_s0, %s408_s30  ;;  %s157_s7 = scalar_lea.vmem [#allocation2], %s397_s29 }
  0x15   : > { %s167_s8 = sshll.u32 %s157_s7, 4  ;;  %p693_p0 = pnand %p422_p13, %p659_p4  ;;  %s689_s8 = int_to_ptr.vmem [resolvable:$true] %s167_s8 }
  0x16   : > { %s154_s10 = scalar_lea.sflag [#allocation3], %s153_s28  ;;  %s480_s11 = scalar_lea.hbm %s687_s6, 128 }
  0x17   : > { %p481_p3 = scmp.ne.s32.totalorder %s687_s6, %s480_s11  ;;  %p482_p5 = pneg %p693_p0 }
  0x18   : > { %s485_s21 = scalar_lea.hbm %s804_s0, 256  ;;  %p486_p4 = scmp.lt.u32.totalorder %s687_s6, %s804_s0 }
  0x19   : > { %p483_p6 = pnand %p482_p5, %p481_p3  ;;  %p487_p10 = scmp.lt.u32.totalorder %s485_s21, %s480_s11 }
  0x1a   : > { %p489_p12 = scmp.lt.u32.totalorder %s480_s11, %s687_s6 }
  0x1b   : > { %p484_p7 = pneg %p483_p6  ;;  %p488_p13 = por %p487_p10, %p486_p4 }
  0x1d   : > { %p490_p1 = por %p489_p12, %p488_p13 }
  0x1f   : > { %p491_p2 = pnand %p490_p1, %p484_p7 }
  0x21   : > { %494 = shalt.err (!%p491_p2)
}
  0x22   : > { %s495_s28 = scalar_lea.vmem %s689_s8, 128  ;;  %s594_s29 = smov [#allocation2]  }
  0x23   : > { %p496_p3 = scmp.ne.s32.totalorder %s689_s8, %s495_s28  ;;  %s500_s30 = sshll.u32 %s594_s29, 4  ;;  %s501_s30 = int_to_ptr.vmem [resolvable:$false] %s500_s30 }
  0x24   : > { %s502_s4 = scalar_lea.vmem %s501_s30, 256  ;;  %p503_p9 = scmp.lt.s32.totalorder %s689_s8, %s501_s30 }
  0x25   : > { %p498_p6 = pnand %p496_p3, %p482_p5  ;;  %p504_p4 = scmp.lt.s32.totalorder %s502_s4, %s495_s28 }
  0x27   : > { %p499_p11 = pneg %p498_p6  ;;  %p505_p10 = por %p504_p4, %p503_p9 }
  0x29   : > { %p506_p12 = pnand %p505_p10, %p499_p11 }
  0x2b   : > { %509 = shalt.err (!%p506_p12)
}
  0x2c   : > { %417 = dma.hbm_to_vmem [thread:$0]  (!%p693_p0), %s687_s6, 128, %s689_s8, %s154_s10  }
  0x2d   : > { %p814_p1 = scmp.lt.s32.totalorder %s592_s17, 3  ;;  %p815_p2 = scmp.ge.s32.totalorder %s592_s17, 1 }
  0x2f   : > { %p173_p5 = pnand %p815_p2, %p814_p1 }
  0x30   : > { %s729_s5 = sand.u32 (!%p173_p5), 1, %s576_s13  }
  0x31   : > { %176 = sbr.rel (%p173_p5) target bundleno = 209 (0xd1), region = 32  ;;  %s401_s7 = sshll.u32 (!%p173_p5), %s729_s5, 3 }
  0x32   : > { %s179_s11 = scalar_lea.sflag (!%p173_p5), [#allocation3], %s729_s5  ;;  %s182_s9 = scalar_lea.vmem (!%p173_p5), [#allocation2], %s401_s7 }
  0x38   : > { %563 = dma.done.wait (%p665_p8), %s179_s11, 128  }
  0x39   : > { %565 = vsyncadd (%p665_p8), %s179_s11, 4294967168  ;;  %v595_v0 = vmov 0   ;;  %v258_v1 = vld [vmem:[%s805_s1] sm:$0xf]  ;;  %vm211_vm0 = vcmask 1043456   ;;  %v272_v45 = vlaneseq  ;;  %s409_s24 = sshll.u32 %s584_s15, 7 }
  0x3a   : > { %474 = vset.pattern.permute.xlu0 %v595_v0  ;;  %v259_v2 = vld [vmem:[%s806_s2] sm:$0xf]  ;;  %v596_v43 = vmov 839922192   ;;  %s204_s19 = scalar_lea.vmem [#allocation5], %s401_s7  ;;  %s755_s28 = scalar_lea.hbm %s807_s3, %s409_s24 }
  0x3b   : > { %267 = vperm.xlu0 %474, %v258_v1   ;;  %v207_v3 = vld [vmem:[%s182_s9] sm:$0xff]  ;;  %v270_v44 = vunpack.c.l.s4 %v596_v43  ;;  %v273_v48 = vshrl.u32 %v272_v45, 7  ;;  %s309_s21 = sshll.u32 %s204_s19, 4  ;;  %s293_s29 = scalar_lea.sflag [#allocation4], %s729_s5  ;;  %s757_s21 = int_to_ptr.vmem [resolvable:$true] %s309_s21 }
  0x3c   : > { %v209_v4 = vcombine.high %v207_v3, %v207_v3  ;;  %v212_v5 = vsel %vm211_vm0, %v207_v3, 0.0  ;;  %s510_s30 = scalar_lea.vmem %s757_s21, 128  ;;  %p816_p9 = scmp.ne.s32.totalorder %s811_s25, 0 }
  0x3d   : > { %v213_v7 = vrot.slane %v212_v5, 4  ;;  %v271_v47 = vunpack.c.0.s8 %v270_v44  ;;  %p511_p8 = scmp.ne.s32.totalorder %s757_s21, %s510_s30  ;;  %s597_s15 = smov [#allocation5]  }
  0x3e   : > { %v219_v6 = vsel %vm211_vm0, %v209_v4, 0.0  ;;  %s514_s4 = sshll.u32 %s597_s15, 4  ;;  %s515_s4 = int_to_ptr.vmem [resolvable:$false] %s514_s4 }
  0x3f   : > { %280 = vperm.xlu0 %474, %v259_v2   ;;  %v220_v8 = vrot.slane %v219_v6, 4  ;;  %v214_v9 = vadd.f32 %v213_v7, %v212_v5  ;;  %v274_v50 = vsub.s32 %v271_v47, %v273_v48  ;;  %p512_p11 = pnand %p511_p8, %p816_p9  ;;  %s516_s7 = scalar_lea.vmem %s515_s4, 256 }
  0x40   : > { %p517_p7 = scmp.lt.s32.totalorder %s757_s21, %s515_s4  ;;  %p518_p13 = scmp.lt.s32.totalorder %s516_s7, %s510_s30 }
  0x41   : > { %v221_v10 = vadd.f32 %v220_v8, %v219_v6  ;;  %v215_v11 = vrot.slane %v214_v9, 2  ;;  %p513_p0 = pneg %p512_p11 }
  0x42   : > { %p519_p3 = por %p518_p13, %p517_p7 }
  0x43   : > { %v222_v12 = vrot.slane %v221_v10, 2  ;;  %v216_v13 = vadd.f32 %v215_v11, %v214_v9 }
  0x44   : > { %p520_p6 = pnand %p519_p3, %p513_p0 }
  0x45   : > { %v223_v14 = vadd.f32 %v222_v12, %v221_v10  ;;  %v217_v15 = vrot.slane %v216_v13, 1 }
  0x47   : > { %v224_v16 = vrot.slane %v223_v14, 1  ;;  %v218_v17 = vadd.f32 %v217_v15, %v216_v13 }
  0x49   : > { %v225_v18 = vadd.f32 %v224_v16, %v223_v14  ;;  %v227_v19 = vmul.f32 0.25, %v218_v17 }
  0x4b   : > { %v228_v20 = vmul.f32 0.25, %v225_v18 }
  0x4d   : > { %v231_v21 = vcombine.low %v227_v19, %v228_v20 }
  0x4f   : > { %v233_v22 = vsub.f32 %v207_v3, %v231_v21 }
  0x51   : > { %v234_v23 = vmul.f32 %v233_v22, %v233_v22 }
  0x53   : > { %v236_v24 = vcombine.high %v234_v23, %v234_v23  ;;  %v238_v25 = vsel %vm211_vm0, %v234_v23, 0.0 }
  0x54   : > { %v239_v27 = vrot.slane %v238_v25, 4 }
  0x55   : > { %v245_v26 = vsel %vm211_vm0, %v236_v24, 0.0 }
  0x56   : > { %v246_v28 = vrot.slane %v245_v26, 4  ;;  %v240_v29 = vadd.f32 %v239_v27, %v238_v25 }
  0x58   : > { %v247_v30 = vadd.f32 %v246_v28, %v245_v26  ;;  %v241_v31 = vrot.slane %v240_v29, 2 }
  0x5a   : > { %v248_v32 = vrot.slane %v247_v30, 2  ;;  %v242_v33 = vadd.f32 %v241_v31, %v240_v29 }
  0x5c   : > { %v249_v34 = vadd.f32 %v248_v32, %v247_v30  ;;  %v243_v35 = vrot.slane %v242_v33, 1 }
  0x5e   : > { %v250_v36 = vrot.slane %v249_v34, 1  ;;  %v244_v37 = vadd.f32 %v243_v35, %v242_v33 }
  0x60   : > { %v251_v38 = vadd.f32 %v250_v36, %v249_v34  ;;  %v252_v39 = vmul.f32 0.25, %v244_v37 }
  0x62   : > { %v253_v40 = vmul.f32 0.25, %v251_v38  ;;  %v254_v41 = vadd.f32 1e-06, %v252_v39 }
  0x64   : > { %v255_v42 = vadd.f32 1e-06, %v253_v40  ;;  %476 = vrsqrt.f32 %v254_v41 }
  0x66   : > { %478 = vrsqrt.f32 %v255_v42 }
  0x6e   : > { %v477_v46 = vpop.eup %476 }
  0x70   : > { %v479_v49 = vpop.eup %478 }
  0x71   : > { %v262_v51 = vcombine.low %v477_v46, %v479_v49 }
  0x73   : > { %v264_v53 = vmul.f32 %v262_v51, %v233_v22 }
  0xba   : > { %v268_v52 = vpop.permute.xlu0 %267 }
  0xbb   : > { %v275_v54 = vrot.slane %v268_v52, %v274_v50 }
  0xbd   : > { %v277_v56 = vmul.f32 %v275_v54, %v264_v53 }
  0xbe   : > { %v281_v55 = vpop.permute.xlu0 %280 }
  0xbf   : > { %v288_v57 = vrot.slane %v281_v55, %v274_v50 }
  0xc1   : > { %v290_v58 = vadd.f32 %v288_v57, %v277_v56 }
  0xc3   : > { %291 = vst [vmem:[%s204_s19] sm:$0xff] %v290_v58 }
  0xc4   : > { %523 = shalt.err (!%p520_p6)
}
  0xc5   : > { %s524_s5 = scalar_lea.hbm %s755_s28, 128  ;;  %s528_s6 = scalar_lea.hbm %s807_s3, 256 }
  0xc6   : > { %p525_p4 = scmp.ne.s32.totalorder %s755_s28, %s524_s5  ;;  %p529_p1 = scmp.lt.u32.totalorder %s755_s28, %s807_s3 }
  0xc7   : > { %p530_p2 = scmp.lt.u32.totalorder %s528_s6, %s524_s5  ;;  %p532_p8 = scmp.lt.u32.totalorder %s524_s5, %s755_s28 }
  0xc8   : > { %p526_p10 = pnand %p525_p4, %p816_p9 }
  0xc9   : > { %p531_p5 = por %p530_p2, %p529_p1 }
  0xca   : > { %p527_p12 = pneg %p526_p10 }
  0xcb   : > { %p533_p11 = por %p532_p8, %p531_p5 }
  0xcd   : > { %p534_p0 = pnand %p533_p11, %p527_p12 }
  0xcf   : > { %537 = shalt.err (!%p534_p0)
}
  0xd0   : > { %412 = dma.vmem_to_hbm [thread:$0]  (%p816_p9), %s757_s21, 128, %s755_s28, %s293_s29  }
  0xd1 PF: > { %s321_s18 = sand.u32 1, %s572_s12   ;;  %p817_p7 = scmp.ne.s32.totalorder %s812_s27, 0 }
  0xd2   : > { %p818_p13 = scmp.ge.s32.totalorder %s592_s17, 2  ;;  %s322_s24 = scalar_lea.sflag [#allocation4], %s321_s18 }
  0xd4   : > { %p419_p3 = pnand %p818_p13, %p817_p7 }
  0xd6   : > { %567 = dma.done.wait (!%p419_p3), %s322_s24, 128  }
  0xd7   : > { %569 = vsyncadd (!%p419_p3), %s322_s24, 4294967168  ;;  %s19_s17 = sadd.s32 1, %s592_s17   ;;  %s819_s12 = smov %s576_s13 }
  0xd8   : > { %p16_p6 = scmp.ge.s32.totalorder %s19_s17, 4   ;;  %s820_s13 = smov %s580_s14 }
  0xd9   : > { %s821_s14 = smov %s674_s26  ;;  %s822_s15 = smov %s588_s16 }
  0xda   : > { %s823_s16 = smov %s825_s20  ;;  %18 = sbr.rel (!%p16_p6) target bundleno = 6 (0x6), region = 77 }
  0xe1   :  { %327 = vsyncpa [#allocation3], 1 }
  0xe2   :  { %329 = vsyncpa [#allocation3 + $0x1], 1 }
  0xe3   :  { %330 = vsyncpa [#allocation4], 1 }
  0xe4   :  { %332 = vsyncpa [#allocation4 + $0x1], 1 }

</bundles_post_ra>
